<compile_context>
chip_gen: v5e
topology: v5e:2x2
jax: 0.10.0
libtpu: 0.0.40
codegen_flags: <defaults>
</compile_context>

<pallas_src>
import math

import jax
import jax.numpy as jnp
from jax.experimental import pallas as pl
from jax.experimental.pallas import tpu as pltpu


def _round_up(x, m):
    return ((x + m - 1) // m) * m


def _mlp_kernel(x_ref,
                w0_ref, b0_ref,
                w1_ref, b1_ref,
                w2_ref, b2_ref,
                w3_ref, b3_ref,
                w4_ref, b4_ref,
                o_ref):
    # Epilogue (bias + ReLU) dtype is carried by the bias operands:
    # bf16 on v6e/v7x (bf16 VPU), f32 on v5e/older.
    ep = b0_ref.dtype

    # In-kernel cast of the x tile to bf16 (saves a separate wrapper HBM pass).
    h = x_ref[...].astype(jnp.bfloat16)

    # fc0..fc3: bf16 MXU operands, f32 accumulation, bias+ReLU in `ep`,
    # re-cast to bf16 for the next matmul (a no-op when ep == bf16).
    for w_ref, b_ref in ((w0_ref, b0_ref), (w1_ref, b1_ref),
                         (w2_ref, b2_ref), (w3_ref, b3_ref)):
        acc = jnp.dot(h, w_ref[...], preferred_element_type=jnp.float32)
        h = jnp.maximum(acc.astype(ep) + b_ref[...], 0).astype(jnp.bfloat16)

    # fc4 has a single output feature: contract over H against the (1, H)
    # weight row so the logits come out lane-dense as (1, tile_b) directly
    # (same A @ B.T pattern as q @ k.T; no sublane->lane relayout afterwards).
    logits = jax.lax.dot_general(
        w4_ref[...], h, (((1,), (1,)), ((), ())),
        preferred_element_type=jnp.float32)               # (1, tile_b)
    o_ref[...] = jax.nn.sigmoid(logits + b4_ref[...]).astype(o_ref.dtype)


def default_epilogue_dtype():
    """bf16 epilogue on chips with a bf16 VPU (v6e/v7x); f32 on v5e/older."""
    kind = jax.devices()[0].device_kind.lower()
    return jnp.bfloat16 if ("v6" in kind or "v7" in kind) else jnp.float32


def prepare_params(params, epilogue_dtype=None):
    """One-time cast/reshape of the weights into kernel operands.

    Hoisted out of the per-call forward path so repeated inference calls do
    not re-stream every weight through HBM just to cast it.
    """
    if epilogue_dtype is None:
        epilogue_dtype = default_epilogue_dtype()
    (w0, b0, w1, b1, w2, b2, w3, b3, w4, b4) = params
    H = w0.shape[1]
    bf = jnp.bfloat16
    return (
        w0.astype(bf), b0.reshape(1, H).astype(epilogue_dtype),
        w1.astype(bf), b1.reshape(1, H).astype(epilogue_dtype),
        w2.astype(bf), b2.reshape(1, H).astype(epilogue_dtype),
        w3.astype(bf), b3.reshape(1, H).astype(epilogue_dtype),
        w4.reshape(1, H).astype(bf), b4.reshape(1, 1).astype(jnp.float32),
    )


def three_feedforward(x, kernel_params, *, tile_b=2048,
                      vmem_budget_bytes=24 * 1024 * 1024):
    """Fused 5-layer MLP forward.  x: [B, input_size] f32 -> [B, 1] f32.

    kernel_params must come from prepare_params() (bf16 weights etc.).
    """
    (w0b, b0e, w1b, b1e, w2b, b2e, w3b, b3e, w4_row, b4_s) = kernel_params
    B, d_in = x.shape
    H = w0b.shape[1]
    ep_bytes = jnp.dtype(b0e.dtype).itemsize

    # ---- batch tile selection --------------------------------------------
    #  * multiple of 128 -> the (1, tile_b) output row is lane-dense
    #    (unmasked vst) and the x tile rows are sublane-aligned,
    #  * <= ceil(B/2) rounded to 128 -> >=2 grid steps so both v7x
    #    TensorCores get work when the batch is big enough,
    #  * clamped to a VMEM budget (v7x has 64 MiB physical vs 128 on v5e/v6e).
    tile_b = _round_up(max(int(tile_b), 128), 128)
    tile_b = max(128, min(tile_b, _round_up(pl.cdiv(B, 2), 128)))

    def vmem_bytes(tb):
        x_buf = 2 * tb * d_in * 4                        # f32 x tile, double-buffered
        out_buf = 2 * tb * 4
        weights = 2 * 2 * (d_in * H + 3 * H * H + H)     # bf16, double-buffered
        biases = 2 * (4 * H * ep_bytes + 4)
        interm = tb * H * (4 + ep_bytes + 2)             # f32 acc + epilogue + bf16 operand
        return x_buf + out_buf + weights + biases + interm

    while tile_b > 128 and vmem_bytes(tile_b) > vmem_budget_bytes:
        tile_b = max(128, _round_up(tile_b // 2, 128))

    num_tiles = pl.cdiv(B, tile_b)
    B_pad = num_tiles * tile_b
    if B_pad != B:
        # Only the tile remainder (and the >=128-lane floor for tiny batches)
        # is padded; the common large-batch path streams x straight into the
        # kernel with no extra wrapper HBM pass. Padded rows produce garbage
        # outputs that are sliced off below.
        x = jnp.pad(x, ((0, B_pad - B), (0, 0)))

    full = lambda shape: pl.BlockSpec(shape, lambda i: (0, 0))

    grid_spec = pltpu.PrefetchScalarGridSpec(
        num_scalar_prefetch=0,
        grid=(num_tiles,),
        in_specs=[
            pl.BlockSpec((tile_b, d_in), lambda i: (i, 0)),   # x tile (f32)
            full((d_in, H)), full((1, H)),                    # fc0
            full((H, H)),    full((1, H)),                    # fc1
            full((H, H)),    full((1, H)),                    # fc2
            full((H, H)),    full((1, H)),                    # fc3
            full((1, H)),    full((1, 1)),                    # fc4 (row + scalar)
        ],
        # Lane-dense output: one (1, tile_b) row per grid step.
        out_specs=pl.BlockSpec((1, tile_b), lambda i: (0, i)),
    )

    flops = 2 * B_pad * (d_in * H + 3 * H * H + H)
    bytes_accessed = (
        B_pad * d_in * 4                                                 # x (f32)
        + (w0b.size + w1b.size + w2b.size + w3b.size + w4_row.size) * 2  # bf16 weights
        + (b0e.size + b1e.size + b2e.size + b3e.size) * ep_bytes + 4     # biases
        + B_pad * 4                                                      # output row
    )
    cost = pl.CostEstimate(flops=flops,
                           transcendentals=B_pad,
                           bytes_accessed=bytes_accessed)

    out_row = pl.pallas_call(
        _mlp_kernel,
        out_shape=jax.ShapeDtypeStruct((1, B_pad), jnp.float32),
        grid_spec=grid_spec,
        compiler_params=pltpu.CompilerParams(
            dimension_semantics=("parallel",),
            # More than the 16/32 MiB default scoped limit, but safely below
            # v7x's 64 MiB physical VMEM (and v5e/v6e's 128 MiB).
            vmem_limit_bytes=48 * 1024 * 1024,
        ),
        cost_estimate=cost,
    )(x, w0b, b0e, w1b, b1e, w2b, b2e, w3b, b3e, w4_row, b4_s)

    return out_row.reshape(B_pad, 1)[:B].astype(x.dtype)


def init_linear(key, fan_in, fan_out, dtype=jnp.float32):
    """Deterministic PyTorch-style Linear init; returns W [in,out], b [1,out]."""
    kw, kb = jax.random.split(key)
    bound = 1.0 / math.sqrt(fan_in)
    w = jax.random.uniform(kw, (fan_in, fan_out), dtype, -bound, bound)
    b = jax.random.uniform(kb, (1, fan_out), dtype, -bound, bound)
    return w, b


def reference_forward(x, params):
    (w0, b0, w1, b1, w2, b2, w3, b3, w4, b4) = params
    h = jnp.maximum(x @ w0 + b0, 0.0)
    h = jnp.maximum(h @ w1 + b1, 0.0)
    h = jnp.maximum(h @ w2 + b2, 0.0)
    h = jnp.maximum(h @ w3 + b3, 0.0)
    return jax.nn.sigmoid(h @ w4 + b4)


if __name__ == "__main__":
    B = 16            # batch
    INPUT_SIZE = 64   # input_size
    HIDDEN = 128      # hidden_size

    key = jax.random.PRNGKey(0)
    k_x, k0, k1, k2, k3, k4 = jax.random.split(key, 6)

    x = jax.random.normal(k_x, (B, INPUT_SIZE), jnp.float32)

    w0, b0 = init_linear(k0, INPUT_SIZE, HIDDEN)
    w1, b1 = init_linear(k1, HIDDEN, HIDDEN)
    w2, b2 = init_linear(k2, HIDDEN, HIDDEN)
    w3, b3 = init_linear(k3, HIDDEN, HIDDEN)
    w4, b4 = init_linear(k4, HIDDEN, 1)
    params = (w0, b0, w1, b1, w2, b2, w3, b3, w4, b4)

    # One-time weight preparation (bf16 MXU operands + epilogue-dtype biases),
    # hoisted out of the forward path.
    kernel_params = prepare_params(params)

    out = three_feedforward(x, kernel_params)
    out = jax.block_until_ready(out)

    ref = reference_forward(x, params)
    assert out.shape == (B, 1)
    # bf16 MXU operands / activations (f32 accumulation) -> loosened tolerance
    # vs the f32 reference.  Sigmoid classifier output, so this is fine.
    assert jnp.allclose(out, ref, atol=2e-2, rtol=2e-2), "mismatch vs reference"

    print("KERNEL_OK")
</pallas_src>

<mosaic_0001>
module attributes {stable_mosaic.version = 11 : i64} {
  func.func @_mlp_kernel(%arg0: i32, %arg1: memref<128x64xf32, #tpu.memory_space<vmem>>, %arg2: memref<64x128xbf16, #tpu.memory_space<vmem>>, %arg3: memref<1x128xf32, #tpu.memory_space<vmem>>, %arg4: memref<128x128xbf16, #tpu.memory_space<vmem>>, %arg5: memref<1x128xf32, #tpu.memory_space<vmem>>, %arg6: memref<128x128xbf16, #tpu.memory_space<vmem>>, %arg7: memref<1x128xf32, #tpu.memory_space<vmem>>, %arg8: memref<128x128xbf16, #tpu.memory_space<vmem>>, %arg9: memref<1x128xf32, #tpu.memory_space<vmem>>, %arg10: memref<1x128xbf16, #tpu.memory_space<vmem>>, %arg11: memref<1x1xf32, #tpu.memory_space<vmem>>, %arg12: memref<1x128xf32, #tpu.memory_space<vmem>>) attributes {dimension_semantics = [#tpu.dimension_semantics<parallel>], iteration_bounds = array<i64: 1>, scalar_prefetch = 0 : i64, scratch_operands = 0 : i64, tpu.core_type = #tpu.core_type<tc>, window_params = [{transform_indices = @transform_0, window_bounds = array<i64: 128, 64>}, {pipeline_mode = #tpu.pipeline_mode<synchronous>, transform_indices = @transform_1, window_bounds = array<i64: 64, 128>}, {pipeline_mode = #tpu.pipeline_mode<synchronous>, transform_indices = @transform_2, window_bounds = array<i64: 1, 128>}, {pipeline_mode = #tpu.pipeline_mode<synchronous>, transform_indices = @transform_3, window_bounds = array<i64: 128, 128>}, {pipeline_mode = #tpu.pipeline_mode<synchronous>, transform_indices = @transform_4, window_bounds = array<i64: 1, 128>}, {pipeline_mode = #tpu.pipeline_mode<synchronous>, transform_indices = @transform_5, window_bounds = array<i64: 128, 128>}, {pipeline_mode = #tpu.pipeline_mode<synchronous>, transform_indices = @transform_6, window_bounds = array<i64: 1, 128>}, {pipeline_mode = #tpu.pipeline_mode<synchronous>, transform_indices = @transform_7, window_bounds = array<i64: 128, 128>}, {pipeline_mode = #tpu.pipeline_mode<synchronous>, transform_indices = @transform_8, window_bounds = array<i64: 1, 128>}, {pipeline_mode = #tpu.pipeline_mode<synchronous>, transform_indices = @transform_9, window_bounds = array<i64: 1, 128>}, {pipeline_mode = #tpu.pipeline_mode<synchronous>, transform_indices = @transform_10, window_bounds = array<i64: 1, 1>}, {transform_indices = @transform_11, window_bounds = array<i64: 1, 128>}]} {
    %c0 = arith.constant 0 : index
    %c0_0 = arith.constant 0 : index
    %0 = vector.load %arg1[%c0, %c0_0] : memref<128x64xf32, #tpu.memory_space<vmem>>, vector<128x64xf32>
    %1 = arith.truncf %0 : vector<128x64xf32> to vector<128x64xbf16>
    %c0_1 = arith.constant 0 : index
    %c0_2 = arith.constant 0 : index
    %2 = vector.load %arg2[%c0_1, %c0_2] : memref<64x128xbf16, #tpu.memory_space<vmem>>, vector<64x128xbf16>
    %cst = arith.constant dense<0.000000e+00> : vector<128x128xf32>
    %3 = tpu.matmul %1, %2, %cst {dimension_numbers = #tpu.dot_dimension_numbers<[1], [0], [0], [1], [0, 0, 1, 1], [], []>} : vector<128x64xbf16>, vector<64x128xbf16>, vector<128x128xf32> -> vector<128x128xf32>
    %c0_3 = arith.constant 0 : index
    %c0_4 = arith.constant 0 : index
    %4 = vector.load %arg3[%c0_3, %c0_4] : memref<1x128xf32, #tpu.memory_space<vmem>>, vector<1x128xf32>
    %5 = vector.broadcast %4 : vector<1x128xf32> to vector<128x128xf32>
    %6 = arith.addf %3, %5 : vector<128x128xf32>
    %cst_5 = arith.constant 0.000000e+00 : f32
    %7 = vector.broadcast %cst_5 : f32 to vector<128x128xf32>
    %8 = arith.maximumf %6, %7 : vector<128x128xf32>
    %9 = arith.truncf %8 : vector<128x128xf32> to vector<128x128xbf16>
    %c0_6 = arith.constant 0 : index
    %c0_7 = arith.constant 0 : index
    %10 = vector.load %arg4[%c0_6, %c0_7] : memref<128x128xbf16, #tpu.memory_space<vmem>>, vector<128x128xbf16>
    %cst_8 = arith.constant dense<0.000000e+00> : vector<128x128xf32>
    %11 = tpu.matmul %9, %10, %cst_8 {dimension_numbers = #tpu.dot_dimension_numbers<[1], [0], [0], [1], [0, 0, 1, 1], [], []>} : vector<128x128xbf16>, vector<128x128xbf16>, vector<128x128xf32> -> vector<128x128xf32>
    %c0_9 = arith.constant 0 : index
    %c0_10 = arith.constant 0 : index
    %12 = vector.load %arg5[%c0_9, %c0_10] : memref<1x128xf32, #tpu.memory_space<vmem>>, vector<1x128xf32>
    %13 = vector.broadcast %12 : vector<1x128xf32> to vector<128x128xf32>
    %14 = arith.addf %11, %13 : vector<128x128xf32>
    %cst_11 = arith.constant 0.000000e+00 : f32
    %15 = vector.broadcast %cst_11 : f32 to vector<128x128xf32>
    %16 = arith.maximumf %14, %15 : vector<128x128xf32>
    %17 = arith.truncf %16 : vector<128x128xf32> to vector<128x128xbf16>
    %c0_12 = arith.constant 0 : index
    %c0_13 = arith.constant 0 : index
    %18 = vector.load %arg6[%c0_12, %c0_13] : memref<128x128xbf16, #tpu.memory_space<vmem>>, vector<128x128xbf16>
    %cst_14 = arith.constant dense<0.000000e+00> : vector<128x128xf32>
    %19 = tpu.matmul %17, %18, %cst_14 {dimension_numbers = #tpu.dot_dimension_numbers<[1], [0], [0], [1], [0, 0, 1, 1], [], []>} : vector<128x128xbf16>, vector<128x128xbf16>, vector<128x128xf32> -> vector<128x128xf32>
    %c0_15 = arith.constant 0 : index
    %c0_16 = arith.constant 0 : index
    %20 = vector.load %arg7[%c0_15, %c0_16] : memref<1x128xf32, #tpu.memory_space<vmem>>, vector<1x128xf32>
    %21 = vector.broadcast %20 : vector<1x128xf32> to vector<128x128xf32>
    %22 = arith.addf %19, %21 : vector<128x128xf32>
    %cst_17 = arith.constant 0.000000e+00 : f32
    %23 = vector.broadcast %cst_17 : f32 to vector<128x128xf32>
    %24 = arith.maximumf %22, %23 : vector<128x128xf32>
    %25 = arith.truncf %24 : vector<128x128xf32> to vector<128x128xbf16>
    %c0_18 = arith.constant 0 : index
    %c0_19 = arith.constant 0 : index
    %26 = vector.load %arg8[%c0_18, %c0_19] : memref<128x128xbf16, #tpu.memory_space<vmem>>, vector<128x128xbf16>
    %cst_20 = arith.constant dense<0.000000e+00> : vector<128x128xf32>
    %27 = tpu.matmul %25, %26, %cst_20 {dimension_numbers = #tpu.dot_dimension_numbers<[1], [0], [0], [1], [0, 0, 1, 1], [], []>} : vector<128x128xbf16>, vector<128x128xbf16>, vector<128x128xf32> -> vector<128x128xf32>
    %c0_21 = arith.constant 0 : index
    %c0_22 = arith.constant 0 : index
    %28 = vector.load %arg9[%c0_21, %c0_22] : memref<1x128xf32, #tpu.memory_space<vmem>>, vector<1x128xf32>
    %29 = vector.broadcast %28 : vector<1x128xf32> to vector<128x128xf32>
    %30 = arith.addf %27, %29 : vector<128x128xf32>
    %cst_23 = arith.constant 0.000000e+00 : f32
    %31 = vector.broadcast %cst_23 : f32 to vector<128x128xf32>
    %32 = arith.maximumf %30, %31 : vector<128x128xf32>
    %33 = arith.truncf %32 : vector<128x128xf32> to vector<128x128xbf16>
    %c0_24 = arith.constant 0 : index
    %c0_25 = arith.constant 0 : index
    %34 = vector.load %arg10[%c0_24, %c0_25] : memref<1x128xbf16, #tpu.memory_space<vmem>>, vector<1x128xbf16>
    %cst_26 = arith.constant dense<0.000000e+00> : vector<1x128xf32>
    %35 = tpu.matmul %34, %33, %cst_26 {dimension_numbers = #tpu.dot_dimension_numbers<[1], [1], [0], [0], [0, 0, 1, 0], [], []>} : vector<1x128xbf16>, vector<128x128xbf16>, vector<1x128xf32> -> vector<1x128xf32>
    %c0_27 = arith.constant 0 : index
    %c0_28 = arith.constant 0 : index
    %36 = vector.load %arg11[%c0_27, %c0_28] : memref<1x1xf32, #tpu.memory_space<vmem>>, vector<1x1xf32>
    %37 = vector.broadcast %36 : vector<1x1xf32> to vector<1x128xf32>
    %38 = arith.addf %35, %37 : vector<1x128xf32>
    %39 = arith.negf %38 : vector<1x128xf32>
    %40 = math.exp %39 : vector<1x128xf32>
    %cst_29 = arith.constant 1.000000e+00 : f32
    %41 = vector.broadcast %cst_29 : f32 to vector<1x128xf32>
    %42 = arith.addf %41, %40 : vector<1x128xf32>
    %43 = arith.divf %41, %42 : vector<1x128xf32>
    %c0_30 = arith.constant 0 : index
    %c0_31 = arith.constant 0 : index
    %44 = vector.load %arg12[%c0_30, %c0_31] : memref<1x128xf32, #tpu.memory_space<vmem>>, vector<1x128xf32>
    tpu.vector_store %arg12[%c0_30, %c0_31], %43 {strides = array<i32>} : memref<1x128xf32, #tpu.memory_space<vmem>>, vector<1x128xf32>,
    return
  }
  func.func @transform_0(%arg0: i32) -> (i32, i32) {
    %c0_i32 = arith.constant 0 : i32
    %c0_i32_0 = arith.constant 0 : i32
    return %arg0, %c0_i32 : i32, i32
  }
  func.func @transform_1(%arg0: i32) -> (i32, i32) {
    %c0_i32 = arith.constant 0 : i32
    %c0_i32_0 = arith.constant 0 : i32
    %c0_i32_1 = arith.constant 0 : i32
    return %c0_i32, %c0_i32_0 : i32, i32
  }
  func.func @transform_2(%arg0: i32) -> (i32, i32) {
    %c0_i32 = arith.constant 0 : i32
    %c0_i32_0 = arith.constant 0 : i32
    %c0_i32_1 = arith.constant 0 : i32
    return %c0_i32, %c0_i32_0 : i32, i32
  }
  func.func @transform_3(%arg0: i32) -> (i32, i32) {
    %c0_i32 = arith.constant 0 : i32
    %c0_i32_0 = arith.constant 0 : i32
    %c0_i32_1 = arith.constant 0 : i32
    return %c0_i32, %c0_i32_0 : i32, i32
  }
  func.func @transform_4(%arg0: i32) -> (i32, i32) {
    %c0_i32 = arith.constant 0 : i32
    %c0_i32_0 = arith.constant 0 : i32
    %c0_i32_1 = arith.constant 0 : i32
    return %c0_i32, %c0_i32_0 : i32, i32
  }
  func.func @transform_5(%arg0: i32) -> (i32, i32) {
    %c0_i32 = arith.constant 0 : i32
    %c0_i32_0 = arith.constant 0 : i32
    %c0_i32_1 = arith.constant 0 : i32
    return %c0_i32, %c0_i32_0 : i32, i32
  }
  func.func @transform_6(%arg0: i32) -> (i32, i32) {
    %c0_i32 = arith.constant 0 : i32
    %c0_i32_0 = arith.constant 0 : i32
    %c0_i32_1 = arith.constant 0 : i32
    return %c0_i32, %c0_i32_0 : i32, i32
  }
  func.func @transform_7(%arg0: i32) -> (i32, i32) {
    %c0_i32 = arith.constant 0 : i32
    %c0_i32_0 = arith.constant 0 : i32
    %c0_i32_1 = arith.constant 0 : i32
    return %c0_i32, %c0_i32_0 : i32, i32
  }
  func.func @transform_8(%arg0: i32) -> (i32, i32) {
    %c0_i32 = arith.constant 0 : i32
    %c0_i32_0 = arith.constant 0 : i32
    %c0_i32_1 = arith.constant 0 : i32
    return %c0_i32, %c0_i32_0 : i32, i32
  }
  func.func @transform_9(%arg0: i32) -> (i32, i32) {
    %c0_i32 = arith.constant 0 : i32
    %c0_i32_0 = arith.constant 0 : i32
    %c0_i32_1 = arith.constant 0 : i32
    return %c0_i32, %c0_i32_0 : i32, i32
  }
  func.func @transform_10(%arg0: i32) -> (i32, i32) {
    %c0_i32 = arith.constant 0 : i32
    %c0_i32_0 = arith.constant 0 : i32
    %c0_i32_1 = arith.constant 0 : i32
    return %c0_i32, %c0_i32_0 : i32, i32
  }
  func.func @transform_11(%arg0: i32) -> (i32, i32) {
    %c0_i32 = arith.constant 0 : i32
    %c0_i32_0 = arith.constant 0 : i32
    return %c0_i32, %arg0 : i32, i32
  }
}

</mosaic_0001>

<bundles_post_ra>
// kernel: tpu_custom_call.1
= control target key start
LH: loop header
LB: loop body
LE: loop exit
PB: predicated region body
PF: predicated region fallthrough
CT: control target
= control target key end

     0   :  { %s1165_s0 = inlined_call_operand.vmem [shape: f32[128,64], index: 0, kind: input, shape index: {}]   ;;  %s1166_s1 = inlined_call_operand.hbm [shape: bf16[64,128], index: 1, kind: input, shape index: {}]   ;;  %s1167_s2 = inlined_call_operand.vmem [shape: f32[1,128], index: 2, kind: input, shape index: {}]   ;;  %s1168_s3 = inlined_call_operand.vmem [shape: bf16[128,128], index: 3, kind: input, shape index: {}]   ;;  %s1169_s4 = inlined_call_operand.vmem [shape: f32[1,128], index: 4, kind: input, shape index: {}]   ;;  %s1170_s5 = inlined_call_operand.vmem [shape: bf16[128,128], index: 5, kind: input, shape index: {}]   ;;  %s1171_s6 = inlined_call_operand.vmem [shape: f32[1,128], index: 6, kind: input, shape index: {}]   ;;  %s1172_s7 = inlined_call_operand.vmem [shape: bf16[128,128], index: 7, kind: input, shape index: {}]   ;;  %s1173_s8 = inlined_call_operand.vmem [shape: f32[1,128], index: 8, kind: input, shape index: {}]   ;;  %s1174_s9 = inlined_call_operand.vmem [shape: bf16[1,128], index: 9, kind: input, shape index: {}]   ;;  %s1175_s10 = inlined_call_operand.<no memory space> [shape: f32[1,1], index: 10, kind: input, shape index: {}]   ;;  %s1176_s11 = inlined_call_operand.hbm [shape: f32[1,128], index: 11, kind: output, shape index: {}]  }
   0x1   :  { %v16_v0 = vstv %s1175_s10 }
   0x2   :  { %17 = vst [vmem:[#allocation2] sm:$0x1] %v16_v0 }
   0x3   :  { %18 = vsyncpa [#allocation4], 0 }
   0x4   :  { %19 = vsyncpa [#allocation5], 0  ;;  %s26_s21 = sshll.u32 %s1166_s1, 4  ;;  %s912_s22 = smov [#allocation3]   ;;  %s27_s21 = int_to_ptr.hbm [resolvable:$true] %s26_s21 }
   0x5   :  { %s28_s23 = sshll.u32 %s912_s22, 4  ;;  %s913_s24 = smov 64   ;;  %s29_s23 = int_to_ptr.vmem [resolvable:$true] %s28_s23 }
   0x6   :  { %s914_s25 = smov 4  }
   0x7   :  { %34 = dma.hbm_to_vmem [thread:$0]  %s27_s21, 512, %s29_s23, [#allocation4], %s913_s24, %s913_s24, %s914_s25  }
   0x8   :  { %908 = dma.done.wait [#allocation4], 512  }
   0x9   :  { %909 = vsyncadd [#allocation4], 4294966784  ;;  %v821_v1 = vld [vmem:[#allocation3 + $0x18] sm:$0xff]  ;;  %v820_v2 = vld [vmem:[#allocation3 + $0x10] sm:$0xff]  ;;  %vm118_vm0 = vcmask 523264   ;;  %s916_s21 = smov [#allocation6]  }
   0xa   :  { %147 = vmatpush.bf16.msra.mxu0 %v821_v1  ;;  %v819_v3 = vld [vmem:[#allocation3 + $0x8] sm:$0xff]  ;;  %v818_v4 = vld [vmem:[#allocation3] sm:$0xff]  ;;  %v61_v9 = vld [vmem:[%s1165_s0 + $0x18] sm:$0xff]  ;;  %s687_s24 = sshll.u32 %s1176_s11, 4  ;;  %s688_s24 = int_to_ptr.hbm [resolvable:$true] %s687_s24 }
   0xb   :  { %v58_v5 = vld [vmem:[%s1165_s0] sm:$0xff]  ;;  %v59_v6 = vld [vmem:[%s1165_s0 + $0x8] sm:$0xff]  ;;  %v60_v8 = vld [vmem:[%s1165_s0 + $0x10] sm:$0xff] }
   0xc   :  { %v74_v7 = vpack.c.bf16 %v59_v6, %v58_v5  ;;  %v75_v10 = vpack.c.bf16 %v61_v9, %v60_v8  ;;  %v62_v11 = vld [vmem:[%s1165_s0 + $0x20] sm:$0xff]  ;;  %v63_v12 = vld [vmem:[%s1165_s0 + $0x28] sm:$0xff]  ;;  %v64_v14 = vld [vmem:[%s1165_s0 + $0x30] sm:$0xff] }
   0xd   :  { %v76_v13 = vpack.c.bf16 %v63_v12, %v62_v11  ;;  %v65_v15 = vld [vmem:[%s1165_s0 + $0x38] sm:$0xff]  ;;  %v66_v17 = vld [vmem:[%s1165_s0 + $0x40] sm:$0xff]  ;;  %v67_v18 = vld [vmem:[%s1165_s0 + $0x48] sm:$0xff] }
   0xe   :  { %148 = vmatpush.bf16.msra.mxu0 %v820_v2  ;;  %v77_v16 = vpack.c.bf16 %v65_v15, %v64_v14  ;;  %v78_v19 = vpack.c.bf16 %v67_v18, %v66_v17  ;;  %v829_v20 = vld [vmem:[%s1168_s3 + $0x38] sm:$0xff]  ;;  %v68_v21 = vld [vmem:[%s1165_s0 + $0x50] sm:$0xff]  ;;  %v827_v25 = vld [vmem:[%s1168_s3 + $0x28] sm:$0xff] }
   0xf   :  { %284 = vmatpush.bf16.msra.mxu1 %v829_v20  ;;  %v69_v22 = vld [vmem:[%s1165_s0 + $0x58] sm:$0xff]  ;;  %v828_v24 = vld [vmem:[%s1168_s3 + $0x30] sm:$0xff]  ;;  %v826_v26 = vld [vmem:[%s1168_s3 + $0x20] sm:$0xff] }
  0x10   :  { %v79_v23 = vpack.c.bf16 %v69_v22, %v68_v21  ;;  %v70_v27 = vld [vmem:[%s1165_s0 + $0x60] sm:$0xff]  ;;  %v71_v28 = vld [vmem:[%s1165_s0 + $0x68] sm:$0xff]  ;;  %v825_v29 = vld [vmem:[%s1168_s3 + $0x18] sm:$0xff] }
  0x11   :  { %v80_v30 = vpack.c.bf16 %v71_v28, %v70_v27  ;;  %v824_v31 = vld [vmem:[%s1168_s3 + $0x10] sm:$0xff]  ;;  %v823_v32 = vld [vmem:[%s1168_s3 + $0x8] sm:$0xff]  ;;  %v822_v33 = vld [vmem:[%s1168_s3] sm:$0xff] }
  0x12   :  { %149 = vmatpush.bf16.msra.mxu0 %v819_v3  ;;  %v72_v34 = vld [vmem:[%s1165_s0 + $0x70] sm:$0xff]  ;;  %v73_v35 = vld [vmem:[%s1165_s0 + $0x78] sm:$0xff]  ;;  %v1066_v38 = vld [vmem:[%s1167_s2] ss:$0 sm:$0xff] }
  0x13   :  { %285 = vmatpush.bf16.msra.mxu1 %v828_v24  ;;  %v81_v36 = vpack.c.bf16 %v73_v35, %v72_v34  ;;  %v836_v17 = vld [vmem:[%s1170_s5 + $0x30] sm:$0xff]  ;;  %v834_v20 = vld [vmem:[%s1170_s5 + $0x20] sm:$0xff]  ;;  %v833_v24 = vld [vmem:[%s1170_s5 + $0x18] sm:$0xff] }
  0x14   :  { %v832_v28 = vld [vmem:[%s1170_s5 + $0x10] sm:$0xff] }
  0x16   :  { %150 = vmatpush.bf16.msra.mxu0 %v818_v4 }
  0x17   :  { %286 = vmatpush.bf16.msra.mxu1 %v827_v25 }
  0x19   :  { %713 = vmatmul.msk.bf16.vlgmr.msra.gmra.mxu0 %vm118_vm0, %v74_v7 }
  0x1b   :  { %287 = vmatpush.bf16.msra.mxu1 %v826_v26 }
  0x1f   :  { %288 = vmatpush.bf16.msra.mxu1 %v825_v29 }
  0x23   :  { %289 = vmatpush.bf16.msra.mxu1 %v824_v31  ;;  %v830_v31 = vld [vmem:[%s1170_s5] sm:$0xff] }
  0x27   :  { %290 = vmatpush.bf16.msra.mxu1 %v823_v32 }
  0x29   :  { %714 = vmatmul.msk.bf16.gmra.mxu0 %vm118_vm0, %v75_v10 }
  0x2b   :  { %291 = vmatpush.bf16.msra.mxu1 %v822_v33 }
  0x39   :  { %715 = vmatmul.msk.bf16.gmra.mxu0 %vm118_vm0, %v76_v13  ;;  %v837_v13 = vld [vmem:[%s1170_s5 + $0x38] sm:$0xff] }
  0x3a   :  { %425 = vmatpush.bf16.msra.mxu2 %v837_v13 }
  0x3e   :  { %426 = vmatpush.bf16.msra.mxu2 %v836_v17  ;;  %v845_v17 = vld [vmem:[%s1172_s7 + $0x38] sm:$0xff] }
  0x3f   :  { %566 = vmatpush.bf16.msra.mxu3 %v845_v17 }
  0x49   :  { %716 = vmatmul.msk.bf16.gmra.mxu0 %vm118_vm0, %v77_v16 }
  0x59   :  { %717 = vmatmul.msk.bf16.gmra.mxu0 %vm118_vm0, %v78_v19  ;;  %v835_v19 = vld [vmem:[%s1170_s5 + $0x28] sm:$0xff] }
  0x5a   :  { %427 = vmatpush.bf16.msra.mxu2 %v835_v19  ;;  %v844_v19 = vld [vmem:[%s1172_s7 + $0x30] sm:$0xff] }
  0x5b   :  { %567 = vmatpush.bf16.msra.mxu3 %v844_v19 }
  0x5e   :  { %428 = vmatpush.bf16.msra.mxu2 %v834_v20  ;;  %v843_v20 = vld [vmem:[%s1172_s7 + $0x28] sm:$0xff] }
  0x5f   :  { %568 = vmatpush.bf16.msra.mxu3 %v843_v20 }
  0x62   :  { %429 = vmatpush.bf16.msra.mxu2 %v833_v24  ;;  %v842_v24 = vld [vmem:[%s1172_s7 + $0x20] sm:$0xff] }
  0x63   :  { %569 = vmatpush.bf16.msra.mxu3 %v842_v24 }
  0x66   :  { %430 = vmatpush.bf16.msra.mxu2 %v832_v28 }
  0x69   :  { %718 = vmatmul.msk.bf16.gmra.mxu0 %vm118_vm0, %v79_v23 }
  0x79   :  { %719 = vmatmul.msk.bf16.gmra.mxu0 %vm118_vm0, %v80_v30  ;;  %v831_v30 = vld [vmem:[%s1170_s5 + $0x8] sm:$0xff] }
  0x7a   :  { %431 = vmatpush.bf16.msra.mxu2 %v831_v30  ;;  %v840_v30 = vld [vmem:[%s1172_s7 + $0x10] sm:$0xff] }
  0x7e   :  { %432 = vmatpush.bf16.msra.mxu2 %v830_v31 }
  0x89   :  { %720 = vmatmul.msk.bf16.gmra.mxu0 %vm118_vm0, %v81_v36 }
  0x96   :  { %v152_v37 = vpop.f32.mrf.mxu0 }
  0x97   :  { %v153_v39 = vadd.f32 %v1066_v38, %v152_v37 }
  0x99   :  { %v192_v42 = vmax.f32 %v153_v39, 0.0 }
  0x9e   :  { %v154_v40 = vpop.f32.mrf.mxu0 }
  0x9f   :  { %v155_v41 = vadd.f32 %v1066_v38, %v154_v40  ;;  %v1111_v40 = vld [vmem:[%s1169_s4] ss:$0 sm:$0xff] }
  0xa1   :  { %v193_v43 = vmax.f32 %v155_v41, 0.0 }
  0xa3   :  { %v208_v44 = vpack.c.bf16 %v193_v43, %v192_v42 }
  0xa5   :  { %292 = vmatmul.bf16.vlgmr.msra.gmra.mxu1 %v208_v44 }
  0xa6   :  { %v157_v45 = vpop.f32.mrf.mxu0 }
  0xa7   :  { %v158_v46 = vadd.f32 %v1066_v38, %v157_v45 }
  0xa9   :  { %v194_v49 = vmax.f32 %v158_v46, 0.0 }
  0xae   :  { %v159_v47 = vpop.f32.mrf.mxu0 }
  0xaf   :  { %v160_v48 = vadd.f32 %v1066_v38, %v159_v47 }
  0xb1   :  { %v195_v50 = vmax.f32 %v160_v48, 0.0 }
  0xb3   :  { %v209_v51 = vpack.c.bf16 %v195_v50, %v194_v49 }
  0xb5   :  { %297 = vmatmul.bf16.gmra.mxu1 %v209_v51 }
  0xb6   :  { %v162_v52 = vpop.f32.mrf.mxu0 }
  0xb7   :  { %v163_v53 = vadd.f32 %v1066_v38, %v162_v52 }
  0xb9   :  { %v196_v56 = vmax.f32 %v163_v53, 0.0 }
  0xbe   :  { %v164_v54 = vpop.f32.mrf.mxu0 }
  0xbf   :  { %v165_v55 = vadd.f32 %v1066_v38, %v164_v54 }
  0xc1   :  { %v197_v57 = vmax.f32 %v165_v55, 0.0 }
  0xc3   :  { %v210_v58 = vpack.c.bf16 %v197_v57, %v196_v56 }
  0xc5   :  { %302 = vmatmul.bf16.gmra.mxu1 %v210_v58 }
  0xc6   :  { %v167_v59 = vpop.f32.mrf.mxu0 }
  0xc7   :  { %v168_v60 = vadd.f32 %v1066_v38, %v167_v59 }
  0xc9   :  { %v198_v63 = vmax.f32 %v168_v60, 0.0 }
  0xce   :  { %v169_v61 = vpop.f32.mrf.mxu0 }
  0xcf   :  { %v170_v62 = vadd.f32 %v1066_v38, %v169_v61 }
  0xd1   :  { %v199_v0 = vmax.f32 %v170_v62, 0.0 }
  0xd3   :  { %v211_v1 = vpack.c.bf16 %v199_v0, %v198_v63 }
  0xd5   :  { %307 = vmatmul.bf16.gmra.mxu1 %v211_v1 }
  0xd6   :  { %v172_v2 = vpop.f32.mrf.mxu0 }
  0xd7   :  { %v173_v3 = vadd.f32 %v1066_v38, %v172_v2 }
  0xd9   :  { %v200_v6 = vmax.f32 %v173_v3, 0.0 }
  0xde   :  { %v174_v4 = vpop.f32.mrf.mxu0 }
  0xdf   :  { %v175_v5 = vadd.f32 %v1066_v38, %v174_v4 }
  0xe1   :  { %v201_v7 = vmax.f32 %v175_v5, 0.0 }
  0xe3   :  { %v212_v8 = vpack.c.bf16 %v201_v7, %v200_v6 }
  0xe5   :  { %312 = vmatmul.bf16.gmra.mxu1 %v212_v8 }
  0xe6   :  { %v177_v9 = vpop.f32.mrf.mxu0 }
  0xe7   :  { %v178_v10 = vadd.f32 %v1066_v38, %v177_v9 }
  0xe9   :  { %v202_v14 = vmax.f32 %v178_v10, 0.0 }
  0xee   :  { %v179_v11 = vpop.f32.mrf.mxu0 }
  0xef   :  { %v180_v12 = vadd.f32 %v1066_v38, %v179_v11 }
  0xf1   :  { %v203_v15 = vmax.f32 %v180_v12, 0.0 }
  0xf3   :  { %v213_v16 = vpack.c.bf16 %v203_v15, %v202_v14 }
  0xf5   :  { %317 = vmatmul.bf16.gmra.mxu1 %v213_v16 }
  0xf6   :  { %v182_v18 = vpop.f32.mrf.mxu0 }
  0xf7   :  { %v183_v21 = vadd.f32 %v1066_v38, %v182_v18 }
  0xf9   :  { %v204_v25 = vmax.f32 %v183_v21, 0.0 }
  0xfe   :  { %v184_v22 = vpop.f32.mrf.mxu0 }
  0xff   :  { %v185_v23 = vadd.f32 %v1066_v38, %v184_v22 }
 0x101   :  { %v205_v26 = vmax.f32 %v185_v23, 0.0 }
 0x103   :  { %v214_v27 = vpack.c.bf16 %v205_v26, %v204_v25 }
 0x105   :  { %322 = vmatmul.bf16.gmra.mxu1 %v214_v27 }
 0x106   :  { %v187_v29 = vpop.f32.mrf.mxu0 }
 0x107   :  { %v188_v32 = vadd.f32 %v1066_v38, %v187_v29  ;;  %v841_v29 = vld [vmem:[%s1172_s7 + $0x18] sm:$0xff] }
 0x108   :  { %570 = vmatpush.bf16.msra.mxu3 %v841_v29 }
 0x109   :  { %v206_v35 = vmax.f32 %v188_v32, 0.0 }
 0x10c   :  { %571 = vmatpush.bf16.msra.mxu3 %v840_v30 }
 0x10e   :  { %v189_v33 = vpop.f32.mrf.mxu0 }
 0x10f   :  { %v190_v34 = vadd.f32 %v1066_v38, %v189_v33  ;;  %v839_v33 = vld [vmem:[%s1172_s7 + $0x8] sm:$0xff] }
 0x110   :  { %572 = vmatpush.bf16.msra.mxu3 %v839_v33  ;;  %v855_v33 = vld [vmem:[%s1173_s8] ss:$0 sm:$0xff] }
 0x111   :  { %v207_v36 = vmax.f32 %v190_v34, 0.0 }
 0x113   :  { %v215_v37 = vpack.c.bf16 %v207_v36, %v206_v35 }
 0x115   :  { %327 = vmatmul.bf16.gmra.mxu1 %v215_v37  ;;  %v838_v37 = vld [vmem:[%s1172_s7] sm:$0xff] }
 0x116   :  { %573 = vmatpush.bf16.msra.mxu3 %v838_v37 }
 0x122   :  { %v293_v39 = vpop.f32.mrf.mxu1 }
 0x123   :  { %v294_v41 = vadd.f32 %v1111_v40, %v293_v39 }
 0x125   :  { %v333_v44 = vmax.f32 %v294_v41, 0.0 }
 0x12a   :  { %v295_v42 = vpop.f32.mrf.mxu1 }
 0x12b   :  { %v296_v43 = vadd.f32 %v1111_v40, %v295_v42  ;;  %v854_v42 = vld [vmem:[%s1171_s6] ss:$0 sm:$0xff] }
 0x12d   :  { %v334_v45 = vmax.f32 %v296_v43, 0.0 }
 0x12f   :  { %v349_v46 = vpack.c.bf16 %v334_v45, %v333_v44 }
 0x131   :  { %433 = vmatmul.bf16.vlgmr.msra.gmra.mxu2 %v349_v46 }
 0x132   :  { %v298_v38 = vpop.f32.mrf.mxu1 }
 0x133   :  { %v299_v47 = vadd.f32 %v1111_v40, %v298_v38 }
 0x135   :  { %v335_v50 = vmax.f32 %v299_v47, 0.0 }
 0x13a   :  { %v300_v48 = vpop.f32.mrf.mxu1 }
 0x13b   :  { %v301_v49 = vadd.f32 %v1111_v40, %v300_v48 }
 0x13d   :  { %v336_v51 = vmax.f32 %v301_v49, 0.0 }
 0x13f   :  { %v350_v52 = vpack.c.bf16 %v336_v51, %v335_v50 }
 0x141   :  { %438 = vmatmul.bf16.gmra.mxu2 %v350_v52 }
 0x142   :  { %v303_v53 = vpop.f32.mrf.mxu1 }
 0x143   :  { %v304_v54 = vadd.f32 %v1111_v40, %v303_v53 }
 0x145   :  { %v337_v57 = vmax.f32 %v304_v54, 0.0 }
 0x14a   :  { %v305_v55 = vpop.f32.mrf.mxu1 }
 0x14b   :  { %v306_v56 = vadd.f32 %v1111_v40, %v305_v55 }
 0x14d   :  { %v338_v58 = vmax.f32 %v306_v56, 0.0 }
 0x14f   :  { %v351_v59 = vpack.c.bf16 %v338_v58, %v337_v57 }
 0x151   :  { %443 = vmatmul.bf16.gmra.mxu2 %v351_v59 }
 0x152   :  { %v308_v60 = vpop.f32.mrf.mxu1 }
 0x153   :  { %v309_v61 = vadd.f32 %v1111_v40, %v308_v60 }
 0x155   :  { %v339_v0 = vmax.f32 %v309_v61, 0.0 }
 0x15a   :  { %v310_v62 = vpop.f32.mrf.mxu1 }
 0x15b   :  { %v311_v63 = vadd.f32 %v1111_v40, %v310_v62 }
 0x15d   :  { %v340_v1 = vmax.f32 %v311_v63, 0.0 }
 0x15f   :  { %v352_v2 = vpack.c.bf16 %v340_v1, %v339_v0 }
 0x161   :  { %448 = vmatmul.bf16.gmra.mxu2 %v352_v2 }
 0x162   :  { %v313_v3 = vpop.f32.mrf.mxu1 }
 0x163   :  { %v314_v4 = vadd.f32 %v1111_v40, %v313_v3 }
 0x165   :  { %v341_v7 = vmax.f32 %v314_v4, 0.0 }
 0x16a   :  { %v315_v5 = vpop.f32.mrf.mxu1 }
 0x16b   :  { %v316_v6 = vadd.f32 %v1111_v40, %v315_v5 }
 0x16d   :  { %v342_v8 = vmax.f32 %v316_v6, 0.0 }
 0x16f   :  { %v353_v9 = vpack.c.bf16 %v342_v8, %v341_v7 }
 0x171   :  { %453 = vmatmul.bf16.gmra.mxu2 %v353_v9 }
 0x172   :  { %v318_v10 = vpop.f32.mrf.mxu1 }
 0x173   :  { %v319_v11 = vadd.f32 %v1111_v40, %v318_v10 }
 0x175   :  { %v343_v14 = vmax.f32 %v319_v11, 0.0 }
 0x17a   :  { %v320_v12 = vpop.f32.mrf.mxu1 }
 0x17b   :  { %v321_v13 = vadd.f32 %v1111_v40, %v320_v12 }
 0x17d   :  { %v344_v15 = vmax.f32 %v321_v13, 0.0 }
 0x17f   :  { %v354_v16 = vpack.c.bf16 %v344_v15, %v343_v14 }
 0x181   :  { %458 = vmatmul.bf16.gmra.mxu2 %v354_v16 }
 0x182   :  { %v323_v18 = vpop.f32.mrf.mxu1 }
 0x183   :  { %v324_v21 = vadd.f32 %v1111_v40, %v323_v18 }
 0x185   :  { %v345_v25 = vmax.f32 %v324_v21, 0.0 }
 0x18a   :  { %v325_v22 = vpop.f32.mrf.mxu1 }
 0x18b   :  { %v326_v23 = vadd.f32 %v1111_v40, %v325_v22 }
 0x18d   :  { %v346_v26 = vmax.f32 %v326_v23, 0.0 }
 0x18f   :  { %v355_v27 = vpack.c.bf16 %v346_v26, %v345_v25 }
 0x191   :  { %463 = vmatmul.bf16.gmra.mxu2 %v355_v27 }
 0x192   :  { %v328_v28 = vpop.f32.mrf.mxu1 }
 0x193   :  { %v329_v31 = vadd.f32 %v1111_v40, %v328_v28 }
 0x195   :  { %v347_v35 = vmax.f32 %v329_v31, 0.0 }
 0x19a   :  { %v330_v32 = vpop.f32.mrf.mxu1 }
 0x19b   :  { %v331_v34 = vadd.f32 %v1111_v40, %v330_v32 }
 0x19d   :  { %v348_v36 = vmax.f32 %v331_v34, 0.0 }
 0x19f   :  { %v356_v39 = vpack.c.bf16 %v348_v36, %v347_v35 }
 0x1a1   :  { %468 = vmatmul.bf16.gmra.mxu2 %v356_v39 }
 0x1b4   :  { %v434_v41 = vpop.f32.mrf.mxu2 }
 0x1b5   :  { %v435_v43 = vadd.f32 %v854_v42, %v434_v41 }
 0x1b7   :  { %v474_v46 = vmax.f32 %v435_v43, 0.0 }
 0x1bc   :  { %v436_v44 = vpop.f32.mrf.mxu2 }
 0x1bd   :  { %v437_v45 = vadd.f32 %v854_v42, %v436_v44 }
 0x1bf   :  { %v475_v40 = vmax.f32 %v437_v45, 0.0 }
 0x1c1   :  { %v490_v38 = vpack.c.bf16 %v475_v40, %v474_v46 }
 0x1c3   :  { %574 = vmatmul.bf16.vlgmr.msra.gmra.mxu3 %v490_v38 }
 0x1c4   :  { %v439_v47 = vpop.f32.mrf.mxu2 }
 0x1c5   :  { %v440_v48 = vadd.f32 %v854_v42, %v439_v47 }
 0x1c7   :  { %v476_v51 = vmax.f32 %v440_v48, 0.0 }
 0x1cc   :  { %v441_v49 = vpop.f32.mrf.mxu2 }
 0x1cd   :  { %v442_v50 = vadd.f32 %v854_v42, %v441_v49 }
 0x1cf   :  { %v477_v52 = vmax.f32 %v442_v50, 0.0 }
 0x1d1   :  { %v491_v53 = vpack.c.bf16 %v477_v52, %v476_v51 }
 0x1d3   :  { %579 = vmatmul.bf16.gmra.mxu3 %v491_v53 }
 0x1d4   :  { %v444_v54 = vpop.f32.mrf.mxu2 }
 0x1d5   :  { %v445_v55 = vadd.f32 %v854_v42, %v444_v54 }
 0x1d7   :  { %v478_v58 = vmax.f32 %v445_v55, 0.0 }
 0x1dc   :  { %v446_v56 = vpop.f32.mrf.mxu2 }
 0x1dd   :  { %v447_v57 = vadd.f32 %v854_v42, %v446_v56 }
 0x1df   :  { %v479_v59 = vmax.f32 %v447_v57, 0.0 }
 0x1e1   :  { %v492_v60 = vpack.c.bf16 %v479_v59, %v478_v58 }
 0x1e3   :  { %584 = vmatmul.bf16.gmra.mxu3 %v492_v60 }
 0x1e4   :  { %v449_v61 = vpop.f32.mrf.mxu2 }
 0x1e5   :  { %v450_v62 = vadd.f32 %v854_v42, %v449_v61 }
 0x1e7   :  { %v480_v1 = vmax.f32 %v450_v62, 0.0 }
 0x1ec   :  { %v451_v63 = vpop.f32.mrf.mxu2 }
 0x1ed   :  { %v452_v0 = vadd.f32 %v854_v42, %v451_v63 }
 0x1ef   :  { %v481_v2 = vmax.f32 %v452_v0, 0.0 }
 0x1f1   :  { %v493_v3 = vpack.c.bf16 %v481_v2, %v480_v1 }
 0x1f3   :  { %589 = vmatmul.bf16.gmra.mxu3 %v493_v3 }
 0x1f4   :  { %v454_v4 = vpop.f32.mrf.mxu2 }
 0x1f5   :  { %v455_v5 = vadd.f32 %v854_v42, %v454_v4 }
 0x1f7   :  { %v482_v8 = vmax.f32 %v455_v5, 0.0 }
 0x1fc   :  { %v456_v6 = vpop.f32.mrf.mxu2 }
 0x1fd   :  { %v457_v7 = vadd.f32 %v854_v42, %v456_v6 }
 0x1ff   :  { %v483_v9 = vmax.f32 %v457_v7, 0.0 }
 0x201   :  { %v494_v10 = vpack.c.bf16 %v483_v9, %v482_v8 }
 0x203   :  { %594 = vmatmul.bf16.gmra.mxu3 %v494_v10 }
 0x204   :  { %v459_v11 = vpop.f32.mrf.mxu2 }
 0x205   :  { %v460_v12 = vadd.f32 %v854_v42, %v459_v11 }
 0x207   :  { %v484_v15 = vmax.f32 %v460_v12, 0.0 }
 0x20c   :  { %v461_v13 = vpop.f32.mrf.mxu2 }
 0x20d   :  { %v462_v14 = vadd.f32 %v854_v42, %v461_v13 }
 0x20f   :  { %v485_v16 = vmax.f32 %v462_v14, 0.0 }
 0x211   :  { %v495_v17 = vpack.c.bf16 %v485_v16, %v484_v15 }
 0x213   :  { %599 = vmatmul.bf16.gmra.mxu3 %v495_v17 }
 0x214   :  { %v464_v18 = vpop.f32.mrf.mxu2 }
 0x215   :  { %v465_v19 = vadd.f32 %v854_v42, %v464_v18 }
 0x217   :  { %v486_v22 = vmax.f32 %v465_v19, 0.0 }
 0x21c   :  { %v466_v20 = vpop.f32.mrf.mxu2 }
 0x21d   :  { %v467_v21 = vadd.f32 %v854_v42, %v466_v20 }
 0x21f   :  { %v487_v23 = vmax.f32 %v467_v21, 0.0 }
 0x221   :  { %v496_v24 = vpack.c.bf16 %v487_v23, %v486_v22 }
 0x223   :  { %604 = vmatmul.bf16.gmra.mxu3 %v496_v24 }
 0x224   :  { %v469_v25 = vpop.f32.mrf.mxu2 }
 0x225   :  { %v470_v26 = vadd.f32 %v854_v42, %v469_v25  ;;  %v640_v25 = vld [vmem:[#allocation2] sm:$0x1] }
 0x227   :  { %v488_v29 = vmax.f32 %v470_v26, 0.0  ;;  %v915_v26 = vmov 0  }
 0x228   :  { %851 = vset.pattern.permute.xlu0 %v915_v26 }
 0x229   :  { %643 = vperm.xlu0 %851, %v640_v25  }
 0x22c   :  { %v471_v27 = vpop.f32.mrf.mxu2 }
 0x22d   :  { %v472_v28 = vadd.f32 %v854_v42, %v471_v27  ;;  %v639_v27 = vld [vmem:[%s1174_s9] sm:$0x1]  ;;  %s685_s9 = sshll.u32 %s916_s21, 4  ;;  %s686_s9 = int_to_ptr.vmem [resolvable:$true] %s685_s9 }
 0x22f   :  { %v489_v30 = vmax.f32 %v472_v28, 0.0 }
 0x231   :  { %v497_v31 = vpack.c.bf16 %v489_v30, %v488_v29 }
 0x233   :  { %609 = vmatmul.bf16.gmra.mxu3 %v497_v31 }
 0x246   :  { %v575_v32 = vpop.f32.mrf.mxu3 }
 0x247   :  { %v576_v34 = vadd.f32 %v855_v33, %v575_v32 }
 0x249   :  { %v615_v37 = vmax.f32 %v576_v34, 0.0 }
 0x24e   :  { %v577_v35 = vpop.f32.mrf.mxu3 }
 0x24f   :  { %v578_v36 = vadd.f32 %v855_v33, %v577_v35 }
 0x251   :  { %v616_v39 = vmax.f32 %v578_v36, 0.0 }
 0x253   :  { %v631_v41 = vpack.c.bf16 %v616_v39, %v615_v37 }
 0x256   :  { %v580_v43 = vpop.f32.mrf.mxu3 }
 0x257   :  { %v581_v44 = vadd.f32 %v855_v33, %v580_v43 }
 0x259   :  { %v617_v42 = vmax.f32 %v581_v44, 0.0 }
 0x25e   :  { %v582_v45 = vpop.f32.mrf.mxu3 }
 0x25f   :  { %v583_v46 = vadd.f32 %v855_v33, %v582_v45 }
 0x261   :  { %v618_v40 = vmax.f32 %v583_v46, 0.0 }
 0x263   :  { %v632_v38 = vpack.c.bf16 %v618_v40, %v617_v42 }
 0x266   :  { %v585_v47 = vpop.f32.mrf.mxu3 }
 0x267   :  { %v586_v48 = vadd.f32 %v855_v33, %v585_v47 }
 0x269   :  { %v619_v51 = vmax.f32 %v586_v48, 0.0 }
 0x26e   :  { %v587_v49 = vpop.f32.mrf.mxu3 }
 0x26f   :  { %v588_v50 = vadd.f32 %v855_v33, %v587_v49 }
 0x271   :  { %v620_v52 = vmax.f32 %v588_v50, 0.0 }
 0x273   :  { %v633_v53 = vpack.c.bf16 %v620_v52, %v619_v51 }
 0x276   :  { %v590_v54 = vpop.f32.mrf.mxu3 }
 0x277   :  { %v591_v55 = vadd.f32 %v855_v33, %v590_v54 }
 0x279   :  { %v621_v58 = vmax.f32 %v591_v55, 0.0 }
 0x27e   :  { %v592_v56 = vpop.f32.mrf.mxu3 }
 0x27f   :  { %v593_v57 = vadd.f32 %v855_v33, %v592_v56 }
 0x281   :  { %v622_v59 = vmax.f32 %v593_v57, 0.0 }
 0x283   :  { %v634_v60 = vpack.c.bf16 %v622_v59, %v621_v58 }
 0x286   :  { %v595_v61 = vpop.f32.mrf.mxu3 }
 0x287   :  { %v596_v62 = vadd.f32 %v855_v33, %v595_v61 }
 0x289   :  { %v623_v1 = vmax.f32 %v596_v62, 0.0 }
 0x28e   :  { %v597_v63 = vpop.f32.mrf.mxu3 }
 0x28f   :  { %v598_v0 = vadd.f32 %v855_v33, %v597_v63 }
 0x291   :  { %v624_v2 = vmax.f32 %v598_v0, 0.0 }
 0x293   :  { %v635_v3 = vpack.c.bf16 %v624_v2, %v623_v1 }
 0x296   :  { %v600_v4 = vpop.f32.mrf.mxu3 }
 0x297   :  { %v601_v21 = vadd.f32 %v855_v33, %v600_v4 }
 0x299   :  { %v625_v23 = vmax.f32 %v601_v21, 0.0 }
 0x29b   :  { %v644_v28 = vpop.permute.xlu0 %643 }
 0x29c   :  { %v646_v29 = vperm.slane %v644_v28, 0 }
 0x29e   :  { %v602_v5 = vpop.f32.mrf.mxu3 }
 0x29f   :  { %v603_v19 = vadd.f32 %v855_v33, %v602_v5 }
 0x2a1   :  { %v626_v22 = vmax.f32 %v603_v19, 0.0 }
 0x2a3   :  { %v636_v24 = vpack.c.bf16 %v626_v22, %v625_v23 }
 0x2a6   :  { %v605_v6 = vpop.f32.mrf.mxu3 }
 0x2a7   :  { %v606_v16 = vadd.f32 %v855_v33, %v605_v6 }
 0x2a9   :  { %v627_v18 = vmax.f32 %v606_v16, 0.0 }
 0x2ae   :  { %v607_v7 = vpop.f32.mrf.mxu3 }
 0x2af   :  { %v608_v14 = vadd.f32 %v855_v33, %v607_v7 }
 0x2b1   :  { %v628_v17 = vmax.f32 %v608_v14, 0.0 }
 0x2b3   :  { %v637_v20 = vpack.c.bf16 %v628_v17, %v627_v18 }
 0x2b6   :  { %v610_v8 = vpop.f32.mrf.mxu3 }
 0x2b7   :  { %v611_v9 = vadd.f32 %v855_v33, %v610_v8 }
 0x2b9   :  { %v629_v12 = vmax.f32 %v611_v9, 0.0 }
 0x2be   :  { %v612_v10 = vpop.f32.mrf.mxu3 }
 0x2bf   :  { %v613_v11 = vadd.f32 %v855_v33, %v612_v10 }
 0x2c1   :  { %v630_v13 = vmax.f32 %v613_v11, 0.0 }
 0x2c3   :  { %v638_v15 = vpack.c.bf16 %v630_v13, %v629_v12 }
 0x2c5   :  { %647 = vmatpush.bf16.xpose.msrb.mxu0 %v638_v15 }
 0x2cd   :  { %648 = vmatpush.bf16.xpose.msrb.mxu0 %v637_v20 }
 0x2d5   :  { %649 = vmatpush.bf16.xpose.msrb.mxu0 %v636_v24 }
 0x2dd   :  { %650 = vmatpush.bf16.xpose.msrb.mxu0 %v635_v3 }
 0x2e5   :  { %651 = vmatpush.bf16.xpose.msrb.mxu0 %v634_v60 }
 0x2ed   :  { %652 = vmatpush.bf16.xpose.msrb.mxu0 %v633_v53 }
 0x2f5   :  { %653 = vmatpush.bf16.xpose.msrb.mxu0 %v632_v38 }
 0x2fd   :  { %654 = vmatpush.bf16.xpose.msrb.mxu0 %v631_v41 }
 0x304   :  { %655 = vmatmul.bf16.vlgmr.msrb.gmra.mxu0 %v639_v27 }
 0x381   :  { %v656_v30 = vpop.f32.mrf.mxu0 }
 0x382   :  { %v657_v31 = vadd.f32 %v656_v30, %v646_v29 }
 0x384   :  { %v817_v32 = vmul.f32 -1.442695, %v657_v31 }
 0x386   :  { %856 = vpow2.f32 %v817_v32 }
 0x389   :  { %v658_v33 = vpop.f32.mrf.mxu0 }
 0x38c   :  { %v857_v34 = vpop.eup %856 }
 0x38d   :  { %v663_v35 = vadd.f32 1.0, %v857_v34 }
 0x38f   :  { %858 = vrcp.f32 %v663_v35  ;;  %v675_v43 = vand.u32 2147483648, %v663_v35  ;;  %v673_v44 = vand.u32 2147483647, %v663_v35  ;;  %vm669_vm2 = vweird.f32 %v663_v35 }
 0x391   :  { %v676_v46 = vor.u32 1.1754944e-38, %v675_v43  ;;  %vm674_vm4 = vcmp.eq.f32.partialorder %v673_v44, 8.507059e+37 }
 0x395   :  { %v859_v36 = vpop.eup %858 }
 0x396   :  { %v665_v37 = vmul.f32 %v859_v36, %v663_v35  ;;  %vm670_vm1 = vweird.f32 %v859_v36 }
 0x397   :  { %vm671_vm3 = vmor %vm669_vm2, %vm670_vm1 }
 0x398   :  { %v666_v39 = vsub.f32 1.0, %v665_v37 }
 0x39a   :  { %v667_v41 = vmul.f32 %v859_v36, %v666_v39 }
 0x39c   :  { %v668_v45 = vadd.f32 %v859_v36, %v667_v41 }
 0x39e   :  { %v672_v42 = vsel %vm671_vm3, %v859_v36, %v668_v45 }
 0x39f   :  { %v677_v40 = vsel %vm674_vm4, %v676_v46, %v672_v42 }
 0x3a0   :  { %679 = vst [vmem:[#allocation6] sm:$0x1] %v677_v40 }
 0x3a1   :  { %690 = dma.vmem_to_hbm [thread:$0]  %s686_s9, 16, %s688_s24, [#allocation5]  }
 0x3a2   :  { %910 = dma.done.wait [#allocation5], 16  }
 0x3a3   :  { %911 = vsyncadd [#allocation5], 4294967280 }
 0x3a4   :  { %695 = vsyncpa [#allocation4], 1 }
 0x3a5   :  { %696 = vsyncpa [#allocation5], 1 }

</bundles_post_ra>
